<compile_context>
chip_gen: v6e
topology: v6e:2x2x1
jax: 0.10.0
libtpu: 0.0.40
codegen_flags: <defaults>
</compile_context>

<pallas_src>
import jax
import jax.numpy as jnp
from jax.experimental import pallas as pl
from jax.experimental.pallas import tpu as pltpu


def _make_folding_kernel(num_layers: int):
    """Kernel computing the whole folded MLP for one (batch, point-tile) block."""

    def kernel(*refs):
        g_ref, cw_ref = refs[0], refs[1]        # (Cg, tile_n), (Cc, tile_n)
        o_ref = refs[-1]                        # (C_last, tile_n)
        p = refs[2:-1]                          # [w0g, w0c, b0, w1, b1, ...]

        # Layer 0: split across the (grids | codewords) channel concat.
        h = (jnp.dot(p[0][...], g_ref[...], preferred_element_type=jnp.float32)
             + jnp.dot(p[1][...], cw_ref[...], preferred_element_type=jnp.float32)
             + p[2][...])
        if num_layers > 1:
            h = jnp.maximum(h, 0.0)             # BN folded into conv; ReLU here

        k = 3
        for li in range(1, num_layers):
            w = p[k][...]                       # (C_out_l, C_in_l)
            b = p[k + 1][...]                   # (C_out_l, 1)
            k += 2
            h = jnp.dot(w, h.astype(w.dtype),
                        preferred_element_type=jnp.float32) + b
            if li < num_layers - 1:
                h = jnp.maximum(h, 0.0)

        o_ref[...] = h.astype(o_ref.dtype)

    return kernel


def folding_layer_pallas(grids, codewords, weights, biases, *, tile_n=None):
    """grids: (B, Cg, N), codewords: (B, Cc, N)  ->  (B, C_last, N)

    weights[l]: (C_in_l, C_out_l)  (eval-mode BN already folded for hidden layers)
    biases[l]:  (1, C_out_l)
    """
    B, cg, N = grids.shape
    Bc, cc, Nc = codewords.shape
    assert Bc == B and Nc == N
    num_layers = len(weights)
    c_out = weights[-1].shape[1]
    out_dtype = grids.dtype

    # Pre-transpose params to (C_out, C_in) / (C_out, 1) so the kernel computes
    # h = W @ h + b with the point axis on lanes.  Split W0 across the concat.
    w0 = weights[0]
    params = [
        jnp.transpose(w0[:cg, :]),              # (h0, Cg)
        jnp.transpose(w0[cg:, :]),              # (h0, Cc)
        jnp.transpose(biases[0]),               # (h0, 1)
    ]
    for w, b in zip(weights[1:], biases[1:]):
        params.append(jnp.transpose(w))         # (oc, ic)
        params.append(jnp.transpose(b))         # (oc, 1)

    # Big lane-dense point tiles; the cap keeps double-buffered blocks small
    # enough for v7x's reduced VMEM while still amortizing per-step overhead.
    if tile_n is None:
        tile_n = min(8192, pl.cdiv(N, 128) * 128)
    n_pad = (-N) % tile_n
    if n_pad:
        grids = jnp.pad(grids, ((0, 0), (0, 0), (0, n_pad)))
        codewords = jnp.pad(codewords, ((0, 0), (0, 0), (0, n_pad)))
    Np = N + n_pad
    grid = (B, Np // tile_n)

    in_specs = [
        pl.BlockSpec((None, cg, tile_n), lambda b, n: (b, 0, n)),
        pl.BlockSpec((None, cc, tile_n), lambda b, n: (b, 0, n)),
    ]
    for prm in params:
        # Grid-invariant residents: constant index_map -> fetched once.
        in_specs.append(pl.BlockSpec(prm.shape, lambda b, n: (0, 0)))

    out = pl.pallas_call(
        _make_folding_kernel(num_layers),
        out_shape=jax.ShapeDtypeStruct((B, c_out, Np), out_dtype),
        grid_spec=pltpu.PrefetchScalarGridSpec(
            num_scalar_prefetch=0,
            grid=grid,
            in_specs=in_specs,
            out_specs=pl.BlockSpec((None, c_out, tile_n),
                                   lambda b, n: (b, 0, n)),
        ),
        compiler_params=pltpu.CompilerParams(
            dimension_semantics=("parallel", "parallel")),
    )(grids, codewords, *params)

    if n_pad:
        out = out[:, :, :N]
    return out


def init_params(key, in_channel, out_channels, eps=1e-5):
    """Deterministic Conv1d + BatchNorm1d params, eval-mode BN folded into conv."""
    weights, biases = [], []
    ic = in_channel
    n_layers = len(out_channels)
    for li, oc in enumerate(out_channels):
        key, kw, kb, kg, kbe, krm, krv = jax.random.split(key, 7)
        # Conv1d(ic, oc, 1): weight (oc, ic, 1) -> matmul form (ic, oc)
        w = jax.random.normal(kw, (ic, oc), jnp.float32) * (1.0 / jnp.sqrt(ic))
        b = jax.random.normal(kb, (1, oc), jnp.float32) * 0.1
        if li < n_layers - 1:
            # BatchNorm1d(oc), inference mode, folded: y = a*(Wx+b) + c
            gamma = 1.0 + 0.1 * jax.random.normal(kg, (oc,), jnp.float32)
            beta = 0.1 * jax.random.normal(kbe, (oc,), jnp.float32)
            rmean = 0.1 * jax.random.normal(krm, (oc,), jnp.float32)
            rvar = 1.0 + 0.2 * jax.random.uniform(krv, (oc,), jnp.float32)
            a = gamma / jnp.sqrt(rvar + eps)
            c = beta - rmean * a
            w = w * a[None, :]
            b = b * a[None, :] + c[None, :]
        weights.append(w)
        biases.append(b)
        ic = oc
    return weights, biases


def reference_forward(grids, codewords, weights, biases):
    x = jnp.concatenate([grids, codewords], axis=1)            # (B, C, N)
    h = jnp.transpose(x, (0, 2, 1))                            # (B, N, C)
    for li, (w, b) in enumerate(zip(weights, biases)):
        h = jnp.einsum("bnc,cd->bnd", h, w,
                       precision=jax.lax.Precision.HIGHEST) + b[None]
        if li < len(weights) - 1:
            h = jnp.maximum(h, 0.0)
    return jnp.transpose(h, (0, 2, 1))                         # (B, C_last, N)


if __name__ == "__main__":
    key = jax.random.PRNGKey(0)
    k_grid, k_code, k_param = jax.random.split(key, 3)

    # Small FoldingNet-style shapes: 2-D grid (2 channels) + 30-dim codeword
    # over N=256 points, MLP out_channels=[32, 32, 3].
    B, N = 2, 256
    c_grid, c_code = 2, 30
    out_channels = [32, 32, 3]

    grids = jax.random.normal(k_grid, (B, c_grid, N), jnp.float32)
    codewords = jax.random.normal(k_code, (B, c_code, N), jnp.float32)

    weights, biases = init_params(k_param, c_grid + c_code, out_channels)

    out = folding_layer_pallas(grids, codewords, weights, biases)
    out = jax.block_until_ready(out)

    ref = reference_forward(grids, codewords, weights, biases)
    assert out.shape == (B, out_channels[-1], N), out.shape
    assert jnp.allclose(out, ref, rtol=2e-2, atol=2e-2), (
        float(jnp.max(jnp.abs(out - ref))))

    print("KERNEL_OK")
</pallas_src>

<mosaic_0001>
module attributes {stable_mosaic.version = 11 : i64} {
  func.func @kernel(%arg0: i32, %arg1: i32, %arg2: memref<1x2x256xf32, #tpu.memory_space<vmem>>, %arg3: memref<1x30x256xf32, #tpu.memory_space<vmem>>, %arg4: memref<32x2xf32, #tpu.memory_space<vmem>>, %arg5: memref<32x30xf32, #tpu.memory_space<vmem>>, %arg6: memref<32x1xf32, #tpu.memory_space<vmem>>, %arg7: memref<32x32xf32, #tpu.memory_space<vmem>>, %arg8: memref<32x1xf32, #tpu.memory_space<vmem>>, %arg9: memref<3x32xf32, #tpu.memory_space<vmem>>, %arg10: memref<3x1xf32, #tpu.memory_space<vmem>>, %arg11: memref<1x3x256xf32, #tpu.memory_space<vmem>>) attributes {dimension_semantics = [#tpu.dimension_semantics<parallel>, #tpu.dimension_semantics<parallel>], iteration_bounds = array<i64: 2, 1>, scalar_prefetch = 0 : i64, scratch_operands = 0 : i64, tpu.core_type = #tpu.core_type<tc>, window_params = [{transform_indices = @transform_0, window_bounds = array<i64: 1, 2, 256>}, {transform_indices = @transform_1, window_bounds = array<i64: 1, 30, 256>}, {pipeline_mode = #tpu.pipeline_mode<synchronous>, transform_indices = @transform_2, window_bounds = array<i64: 32, 2>}, {pipeline_mode = #tpu.pipeline_mode<synchronous>, transform_indices = @transform_3, window_bounds = array<i64: 32, 30>}, {pipeline_mode = #tpu.pipeline_mode<synchronous>, transform_indices = @transform_4, window_bounds = array<i64: 32, 1>}, {pipeline_mode = #tpu.pipeline_mode<synchronous>, transform_indices = @transform_5, window_bounds = array<i64: 32, 32>}, {pipeline_mode = #tpu.pipeline_mode<synchronous>, transform_indices = @transform_6, window_bounds = array<i64: 32, 1>}, {pipeline_mode = #tpu.pipeline_mode<synchronous>, transform_indices = @transform_7, window_bounds = array<i64: 3, 32>}, {pipeline_mode = #tpu.pipeline_mode<synchronous>, transform_indices = @transform_8, window_bounds = array<i64: 3, 1>}, {transform_indices = @transform_9, window_bounds = array<i64: 1, 3, 256>}]} {
    %c0 = arith.constant 0 : index
    %c0_0 = arith.constant 0 : index
    %0 = vector.load %arg4[%c0, %c0_0] : memref<32x2xf32, #tpu.memory_space<vmem>>, vector<32x2xf32>
    %c0_1 = arith.constant 0 : index
    %c0_2 = arith.constant 0 : index
    %c0_3 = arith.constant 0 : index
    %1 = vector.load %arg2[%c0_1, %c0_2, %c0_3] : memref<1x2x256xf32, #tpu.memory_space<vmem>>, vector<1x2x256xf32>
    %2 = vector.shape_cast %1 : vector<1x2x256xf32> to vector<2x256xf32>
    %cst = arith.constant dense<0.000000e+00> : vector<32x256xf32>
    %3 = tpu.matmul %0, %2, %cst {dimension_numbers = #tpu.dot_dimension_numbers<[1], [0], [0], [1], [0, 0, 1, 1], [], []>} : vector<32x2xf32>, vector<2x256xf32>, vector<32x256xf32> -> vector<32x256xf32>
    %c0_4 = arith.constant 0 : index
    %c0_5 = arith.constant 0 : index
    %4 = vector.load %arg5[%c0_4, %c0_5] : memref<32x30xf32, #tpu.memory_space<vmem>>, vector<32x30xf32>
    %c0_6 = arith.constant 0 : index
    %c0_7 = arith.constant 0 : index
    %c0_8 = arith.constant 0 : index
    %5 = vector.load %arg3[%c0_6, %c0_7, %c0_8] : memref<1x30x256xf32, #tpu.memory_space<vmem>>, vector<1x30x256xf32>
    %6 = vector.shape_cast %5 : vector<1x30x256xf32> to vector<30x256xf32>
    %cst_9 = arith.constant dense<0.000000e+00> : vector<32x256xf32>
    %7 = tpu.matmul %4, %6, %cst_9 {dimension_numbers = #tpu.dot_dimension_numbers<[1], [0], [0], [1], [0, 0, 1, 1], [], []>} : vector<32x30xf32>, vector<30x256xf32>, vector<32x256xf32> -> vector<32x256xf32>
    %8 = arith.addf %3, %7 : vector<32x256xf32>
    %c0_10 = arith.constant 0 : index
    %c0_11 = arith.constant 0 : index
    %9 = vector.load %arg6[%c0_10, %c0_11] : memref<32x1xf32, #tpu.memory_space<vmem>>, vector<32x1xf32>
    %10 = vector.broadcast %9 : vector<32x1xf32> to vector<32x256xf32>
    %11 = arith.addf %8, %10 : vector<32x256xf32>
    %cst_12 = arith.constant 0.000000e+00 : f32
    %12 = vector.broadcast %cst_12 : f32 to vector<32x256xf32>
    %13 = arith.maximumf %11, %12 : vector<32x256xf32>
    %c0_13 = arith.constant 0 : index
    %c0_14 = arith.constant 0 : index
    %14 = vector.load %arg7[%c0_13, %c0_14] : memref<32x32xf32, #tpu.memory_space<vmem>>, vector<32x32xf32>
    %c0_15 = arith.constant 0 : index
    %c0_16 = arith.constant 0 : index
    %15 = vector.load %arg8[%c0_15, %c0_16] : memref<32x1xf32, #tpu.memory_space<vmem>>, vector<32x1xf32>
    %cst_17 = arith.constant dense<0.000000e+00> : vector<32x256xf32>
    %16 = tpu.matmul %14, %13, %cst_17 {dimension_numbers = #tpu.dot_dimension_numbers<[1], [0], [0], [1], [0, 0, 1, 1], [], []>} : vector<32x32xf32>, vector<32x256xf32>, vector<32x256xf32> -> vector<32x256xf32>
    %17 = vector.broadcast %15 : vector<32x1xf32> to vector<32x256xf32>
    %18 = arith.addf %16, %17 : vector<32x256xf32>
    %cst_18 = arith.constant 0.000000e+00 : f32
    %19 = vector.broadcast %cst_18 : f32 to vector<32x256xf32>
    %20 = arith.maximumf %18, %19 : vector<32x256xf32>
    %c0_19 = arith.constant 0 : index
    %c0_20 = arith.constant 0 : index
    %21 = vector.load %arg9[%c0_19, %c0_20] : memref<3x32xf32, #tpu.memory_space<vmem>>, vector<3x32xf32>
    %c0_21 = arith.constant 0 : index
    %c0_22 = arith.constant 0 : index
    %22 = vector.load %arg10[%c0_21, %c0_22] : memref<3x1xf32, #tpu.memory_space<vmem>>, vector<3x1xf32>
    %cst_23 = arith.constant dense<0.000000e+00> : vector<3x256xf32>
    %23 = tpu.matmul %21, %20, %cst_23 {dimension_numbers = #tpu.dot_dimension_numbers<[1], [0], [0], [1], [0, 0, 1, 1], [], []>} : vector<3x32xf32>, vector<32x256xf32>, vector<3x256xf32> -> vector<3x256xf32>
    %24 = vector.broadcast %22 : vector<3x1xf32> to vector<3x256xf32>
    %25 = arith.addf %23, %24 : vector<3x256xf32>
    %c0_24 = arith.constant 0 : index
    %c0_25 = arith.constant 0 : index
    %c0_26 = arith.constant 0 : index
    %26 = vector.load %arg11[%c0_24, %c0_25, %c0_26] : memref<1x3x256xf32, #tpu.memory_space<vmem>>, vector<1x3x256xf32>
    %27 = vector.shape_cast %26 : vector<1x3x256xf32> to vector<3x256xf32>
    %28 = vector.shape_cast %25 : vector<3x256xf32> to vector<1x3x256xf32>
    tpu.vector_store %arg11[%c0_24, %c0_25, %c0_26], %28 {strides = array<i32>} : memref<1x3x256xf32, #tpu.memory_space<vmem>>, vector<1x3x256xf32>,
    return
  }
  func.func @transform_0(%arg0: i32, %arg1: i32) -> (i32, i32, i32) {
    %c0_i32 = arith.constant 0 : i32
    %c0_i32_0 = arith.constant 0 : i32
    return %arg0, %c0_i32, %arg1 : i32, i32, i32
  }
  func.func @transform_1(%arg0: i32, %arg1: i32) -> (i32, i32, i32) {
    %c0_i32 = arith.constant 0 : i32
    %c0_i32_0 = arith.constant 0 : i32
    return %arg0, %c0_i32, %arg1 : i32, i32, i32
  }
  func.func @transform_2(%arg0: i32, %arg1: i32) -> (i32, i32) {
    %c0_i32 = arith.constant 0 : i32
    %c0_i32_0 = arith.constant 0 : i32
    %c0_i32_1 = arith.constant 0 : i32
    return %c0_i32, %c0_i32_0 : i32, i32
  }
  func.func @transform_3(%arg0: i32, %arg1: i32) -> (i32, i32) {
    %c0_i32 = arith.constant 0 : i32
    %c0_i32_0 = arith.constant 0 : i32
    %c0_i32_1 = arith.constant 0 : i32
    return %c0_i32, %c0_i32_0 : i32, i32
  }
  func.func @transform_4(%arg0: i32, %arg1: i32) -> (i32, i32) {
    %c0_i32 = arith.constant 0 : i32
    %c0_i32_0 = arith.constant 0 : i32
    %c0_i32_1 = arith.constant 0 : i32
    return %c0_i32, %c0_i32_0 : i32, i32
  }
  func.func @transform_5(%arg0: i32, %arg1: i32) -> (i32, i32) {
    %c0_i32 = arith.constant 0 : i32
    %c0_i32_0 = arith.constant 0 : i32
    %c0_i32_1 = arith.constant 0 : i32
    return %c0_i32, %c0_i32_0 : i32, i32
  }
  func.func @transform_6(%arg0: i32, %arg1: i32) -> (i32, i32) {
    %c0_i32 = arith.constant 0 : i32
    %c0_i32_0 = arith.constant 0 : i32
    %c0_i32_1 = arith.constant 0 : i32
    return %c0_i32, %c0_i32_0 : i32, i32
  }
  func.func @transform_7(%arg0: i32, %arg1: i32) -> (i32, i32) {
    %c0_i32 = arith.constant 0 : i32
    %c0_i32_0 = arith.constant 0 : i32
    %c0_i32_1 = arith.constant 0 : i32
    return %c0_i32, %c0_i32_0 : i32, i32
  }
  func.func @transform_8(%arg0: i32, %arg1: i32) -> (i32, i32) {
    %c0_i32 = arith.constant 0 : i32
    %c0_i32_0 = arith.constant 0 : i32
    %c0_i32_1 = arith.constant 0 : i32
    return %c0_i32, %c0_i32_0 : i32, i32
  }
  func.func @transform_9(%arg0: i32, %arg1: i32) -> (i32, i32, i32) {
    %c0_i32 = arith.constant 0 : i32
    %c0_i32_0 = arith.constant 0 : i32
    return %arg0, %c0_i32, %arg1 : i32, i32, i32
  }
}

</mosaic_0001>

<bundles_post_ra>
// kernel: tpu_custom_call.1
= control target key start
LH: loop header
LB: loop body
LE: loop exit
PB: predicated region body
PF: predicated region fallthrough
CT: control target
= control target key end

     0   :  { %s1157_s30 = smov 0   ;;  %s1159_s10 = smov 0   ;;  %s1290_s0 = inlined_call_operand.vmem [shape: f32[2,2,256], index: 0, kind: input, shape index: {}]   ;;  %s1291_s1 = inlined_call_operand.vmem [shape: f32[2,30,256], index: 1, kind: input, shape index: {}]   ;;  %s1292_s2 = inlined_call_operand.vmem [shape: f32[32,2], index: 2, kind: input, shape index: {}]   ;;  %s1293_s3 = inlined_call_operand.vmem [shape: f32[32,30], index: 3, kind: input, shape index: {}]   ;;  %s1294_s4 = inlined_call_operand.vmem [shape: f32[32,1], index: 4, kind: input, shape index: {}]   ;;  %s1295_s5 = inlined_call_operand.vmem [shape: f32[32,32], index: 5, kind: input, shape index: {}]   ;;  %s1296_s6 = inlined_call_operand.vmem [shape: f32[32,1], index: 6, kind: input, shape index: {}]   ;;  %s1297_s7 = inlined_call_operand.vmem [shape: f32[3,32], index: 7, kind: input, shape index: {}]   ;;  %s1298_s8 = inlined_call_operand.vmem [shape: f32[3,1], index: 8, kind: input, shape index: {}]   ;;  %s1299_s9 = inlined_call_operand.vmem [shape: f32[2,3,256], index: 9, kind: output, shape index: {}]  }
   0x1   :  { %s1161_s11 = smov 0  }
   0x2 LB: > { %s31_s12 = sadd.s32 1, %s1099_s10  ;;  %p1023_p0 = scmp.ge.s32.totalorder %s1103_s11, 1  ;;  %s1103_s11 = sphi %s1161_s11, %s19_s11   ;;  %s1099_s10 = sphi %s1159_s10, %s1301_s10   ;;  %s1095_s30 = sphi %s1157_s30, %s1300_s30  }
   0x3   : > { %p33_p1 = scmp.ge.s32.totalorder %s31_s12, 2  ;;  %p325_p2 = scmp.lt.s32.totalorder %s1103_s11, 3 }
   0x5   : > { %s1303_s12 = smov (%p33_p1, %s31_s12), 0  ;;  %p326_p3 = pnand %p1023_p0, %p325_p2 }
   0x6   : > { %p379_p4 = scmp.lt.s32.totalorder (!%p326_p3), %s1095_s30, 1 }
   0x7   : > { %329 = sbr.rel (%p326_p3) target bundleno = 665 (0x299), region = 56 }
   0xc   : > { %v1105_v0 = vmov 0.0   ;;  %s1305_s30 = smov (!%p379_p4, %s1095_s30), 1  ;;  %v1106_v1 = vmov 0   ;;  %v653_v2 = vld [vmem:[%s1294_s4 + $0x18] sm:$0xff]  ;;  %v651_v3 = vld [vmem:[%s1294_s4 + $0x8] sm:$0xff]  ;;  %vm438_vm0 = vcmask 1045504  }
   0xd   : > { %625 = vmatprep.mubr.f32.mxu1 %v1105_v0  ;;  %509 = vmatprep.mubr.f32.mxu0 %v1105_v0  ;;  %s1051_s17 = sshll.u32 %s1305_s30, 6  ;;  %s1050_s18 = sshll.u32 %s1305_s30, 2  ;;  %v652_v4 = vld [vmem:[%s1294_s4 + $0x10] sm:$0xff]  ;;  %v650_v5 = vld [vmem:[%s1294_s4] sm:$0xff]  ;;  %vm556_vm1 = vcmask 1041408   ;;  %vm543_vm2 = vcmask 15360  }
   0xe   : > { %1080 = vset.pattern.permute.xlu1 %v1106_v1  ;;  %1079 = vset.pattern.permute.xlu0 %v1106_v1  ;;  %s396_s21 = scalar_lea.vmem %s1291_s1, %s1051_s17  ;;  %s386_s24 = scalar_lea.vmem %s1290_s0, %s1050_s18  ;;  %v408_v14 = vld [vmem:[%s1292_s2] sm:$0xff]  ;;  %v697_v17 = vld [vmem:[%s1296_s6 + $0x18] sm:$0xff]  ;;  %vm425_vm3 = vcmask 244736   ;;  %v696_v19 = vld [vmem:[%s1296_s6 + $0x10] sm:$0xff]  ;;  %vm718_vm4 = vcmask 261120  }
   0xf   : > { %671 = vperm.xlu0 %1079, %v653_v2   ;;  %661 = vperm.xlu1 %1080, %v651_v3   ;;  %v424_v6 = vld [vmem:[%s396_s21 + $0x38] sm:$0x3f]  ;;  %v423_v7 = vld [vmem:[%s396_s21 + $0x30] sm:$0x3f]  ;;  %v422_v8 = vld [vmem:[%s396_s21 + $0x28] sm:$0xff]  ;;  %s1052_s14 = sshll.u32 %s1305_s30, 3 }
  0x10   : > { %1030 = vmatprep.subr.msk.mxu0 %vm438_vm0, %v424_v6  ;;  %v421_v9 = vld [vmem:[%s396_s21 + $0x20] sm:$0xff]  ;;  %v420_v11 = vld [vmem:[%s396_s21 + $0x18] sm:$0xff]  ;;  %v419_v13 = vld [vmem:[%s396_s21 + $0x10] sm:$0xff]  ;;  %s406_s17 = scalar_lea.vmem %s1299_s9, %s1052_s14 }
  0x11   : > { %v1036_v10 = vld.sshfl [vmem:[%s386_s24] sm:$0x33 pattern:$0x76325410]  ;;  %1031 = vmatpush1.msk.msra.mxu0 %vm438_vm0, %v423_v7  ;;  %v418_v15 = vld [vmem:[%s396_s21 + $0x8] sm:$0xff]  ;;  %v410_v24 = vld [vmem:[%s1292_s2 + $0x10] sm:$0xff] }
  0x12   : > { %v542_v12 = vcombine.high %v1036_v10, %v1036_v10  ;;  %471 = vmatprep.subr.mxu0 %v422_v8  ;;  %v417_v16 = vld [vmem:[%s396_s21] sm:$0xff]  ;;  %v409_v20 = vld [vmem:[%s1292_s2 + $0x8] sm:$0xff]  ;;  %v415_v26 = vld [vmem:[%s1293_s3 + $0x10] sm:$0xff] }
  0x13   : > { %666 = vperm.xlu0 %1079, %v652_v4   ;;  %656 = vperm.xlu1 %1080, %v650_v5   ;;  %v413_v18 = vld [vmem:[%s1293_s3] sm:$0xff]  ;;  %v695_v21 = vld [vmem:[%s1296_s6 + $0x8] sm:$0xff]  ;;  %v411_v27 = vld [vmem:[%s1292_s2 + $0x18] sm:$0xff] }
  0x14   : > { %472 = vmatpush1.msra.mxu0 %v421_v9  ;;  %1037 = vmatprep.subr.msk.mxu1 %vm556_vm1, %v542_v12  ;;  %v414_v22 = vld [vmem:[%s1293_s3 + $0x8] sm:$0xff]  ;;  %v694_v23 = vld [vmem:[%s1296_s6] sm:$0xff]  ;;  %v416_v28 = vld [vmem:[%s1293_s3 + $0x18] sm:$0xff] }
  0x15   : > { %473 = vmatprep.subr.mxu0 %v420_v11  ;;  %1038 = vmatpush1.msk.msra.mxu1 %vm556_vm1, %v1036_v10  ;;  %v829_v25 = vld [vmem:[%s1298_s8] sm:$0x7]  ;;  %v691_v11 = vld [vmem:[%s1295_s5 + $0x8] sm:$0xff]  ;;  %v692_v12 = vld [vmem:[%s1295_s5 + $0x10] sm:$0xff] }
  0x16   : > { %474 = vmatpush1.msra.mxu0 %v419_v13  ;;  %1039 = vmatmul.mubr.msk.f32.vlgmr.msra.gmra.mxu1 %vm543_vm2, %v408_v14  ;;  %v690_v10 = vld [vmem:[%s1295_s5] sm:$0xff]  ;;  %v693_v13 = vld [vmem:[%s1295_s5 + $0x18] sm:$0xff] }
  0x17   : > { %475 = vmatprep.subr.mxu0 %v418_v15  ;;  %631 = vmatprep.mubr.f32.mxu1 %v1105_v0 }
  0x18   : > { %476 = vmatpush1.msra.mxu0 %v417_v16  ;;  %715 = vperm.xlu0 %1079, %v697_v17  }
  0x19   : > { %1032 = vmatmul.mubr.msk.f32.vlgmr.msra.gmra.mxu0 %vm425_vm3, %v413_v18  ;;  %710 = vperm.xlu1 %1080, %v696_v19  }
  0x1a   : > { %1040 = vmatmul.mubr.msk.f32.gmra.mxu1 %vm543_vm2, %v409_v20  ;;  %515 = vmatprep.mubr.f32.mxu0 %v1105_v0 }
  0x1b   : > { %637 = vmatprep.mubr.f32.mxu1 %v1105_v0 }
  0x1c   : > { %705 = vperm.xlu0 %1079, %v695_v21  }
  0x1d   : > { %1033 = vmatmul.mubr.msk.f32.gmra.mxu0 %vm425_vm3, %v414_v22  ;;  %700 = vperm.xlu1 %1080, %v694_v23  }
  0x1e   : > { %1041 = vmatmul.mubr.msk.f32.gmra.mxu1 %vm543_vm2, %v410_v24  ;;  %521 = vmatprep.mubr.f32.mxu0 %v1105_v0 }
  0x1f   : > { %643 = vmatprep.mubr.f32.mxu1 %v1105_v0 }
  0x20   : > { %832 = vperm.xlu0 %1079, %v829_v25  }
  0x21   : > { %1034 = vmatmul.mubr.msk.f32.gmra.mxu0 %vm425_vm3, %v415_v26 }
  0x22   : > { %1042 = vmatmul.mubr.msk.f32.gmra.mxu1 %vm543_vm2, %v411_v27  ;;  %527 = vmatprep.mubr.f32.mxu0 %v1105_v0 }
  0x23   : > { %795 = vmatprep.mubr.f32.mxu1 %v1105_v0 }
  0x25   : > { %1035 = vmatmul.mubr.msk.f32.gmra.mxu0 %vm425_vm3, %v416_v28 }
  0x26   : > { %902 = vmatprep.mubr.f32.mxu0 %v1105_v0 }
  0x8a   : > { %v672_v40 = vpop.permute.xlu0 %671  ;;  %v662_v44 = vpop.permute.xlu1 %661 }
  0x8e   : > { %v667_v52 = vpop.permute.xlu0 %666  ;;  %v657_v60 = vpop.permute.xlu1 %656 }
  0x93   : > { %v716_v19 = vpop.permute.xlu0 %715 }
  0x94   : > { %v711_v21 = vpop.permute.xlu1 %710 }
  0xd6   : > { %v627_v29 = vpop.f32.mrf.mxu1 }
  0xd8   : > { %v629_v30 = vpop.f32.mrf.mxu1 }
  0xd9   : > { %v511_v31 = vpop.f32.mrf.mxu0 }
  0xda   : > { %v633_v32 = vpop.f32.mrf.mxu1  ;;  %v628_v58 = vadd.f32 %v627_v29, %v511_v31 }
  0xdb   : > { %v513_v33 = vpop.f32.mrf.mxu0 }
  0xdc   : > { %v635_v34 = vpop.f32.mrf.mxu1  ;;  %v630_v55 = vadd.f32 %v629_v30, %v513_v33  ;;  %v674_v4 = vadd.f32 %v657_v60, %v628_v58  ;;  %v701_v30 = vpop.permute.xlu1 %700 }
  0xdd   : > { %v517_v35 = vpop.f32.mrf.mxu0 }
  0xde   : > { %v639_v36 = vpop.f32.mrf.mxu1  ;;  %v634_v53 = vadd.f32 %v633_v32, %v517_v35  ;;  %v675_v2 = vadd.f32 %v657_v60, %v630_v55  ;;  %v682_v9 = vmax.f32 %v674_v4, 0.0 }
  0xdf   : > { %v519_v37 = vpop.f32.mrf.mxu0 }
  0xe0   : > { %v641_v38 = vpop.f32.mrf.mxu1  ;;  %v636_v50 = vadd.f32 %v635_v34, %v519_v37  ;;  %v676_v63 = vadd.f32 %v662_v44, %v634_v53  ;;  %v683_v8 = vmax.f32 %v675_v2, 0.0 }
  0xe1   : > { %v523_v39 = vpop.f32.mrf.mxu0 }
  0xe2   : > { %v645_v42 = vpop.f32.mrf.mxu1  ;;  %v640_v47 = vadd.f32 %v639_v36, %v523_v39  ;;  %v677_v61 = vadd.f32 %v662_v44, %v636_v50  ;;  %v684_v7 = vmax.f32 %v676_v63, 0.0 }
  0xe3   : > { %v525_v41 = vpop.f32.mrf.mxu0 }
  0xe4   : > { %v642_v45 = vadd.f32 %v641_v38, %v525_v41  ;;  %v647_v48 = vpop.f32.mrf.mxu1  ;;  %v678_v59 = vadd.f32 %v667_v52, %v640_v47  ;;  %v685_v6 = vmax.f32 %v677_v61, 0.0  ;;  %v828_v41 = vld [vmem:[%s1297_s7] sm:$0x7] }
  0xe5   : > { %v529_v43 = vpop.f32.mrf.mxu0 }
  0xe6   : > { %v646_v46 = vadd.f32 %v645_v42, %v529_v43  ;;  %v679_v56 = vadd.f32 %v667_v52, %v642_v45  ;;  %v686_v5 = vmax.f32 %v678_v59, 0.0 }
  0xe7   : > { %v531_v49 = vpop.f32.mrf.mxu0 }
  0xe8   : > { %v648_v51 = vadd.f32 %v647_v48, %v531_v49  ;;  %v680_v54 = vadd.f32 %v672_v40, %v646_v46  ;;  %v687_v3 = vmax.f32 %v679_v56, 0.0 }
  0xea   : > { %v681_v57 = vadd.f32 %v672_v40, %v648_v51  ;;  %v688_v1 = vmax.f32 %v680_v54, 0.0 }
  0xec   : > { %v689_v62 = vmax.f32 %v681_v57, 0.0 }
  0xee   : > { %755 = vmatprep.subr.mxu1 %v689_v62 }
  0xef   : > { %756 = vmatpush1.msra.mxu1 %v688_v1 }
  0xf0   : > { %757 = vmatprep.subr.mxu1 %v687_v3 }
  0xf1   : > { %758 = vmatpush1.msra.mxu1 %v686_v5 }
  0xf2   : > { %759 = vmatprep.subr.mxu1 %v685_v6 }
  0xf3   : > { %760 = vmatpush1.msra.mxu1 %v684_v7 }
  0xf4   : > { %761 = vmatprep.subr.mxu1 %v683_v8 }
  0xf5   : > { %762 = vmatpush1.msra.mxu1 %v682_v9 }
  0xf6   : > { %1043 = vmatmul.mubr.msk.f32.vlgmr.msra.gmra.mxu1 %vm718_vm4, %v690_v10 }
  0xf7   : > { %801 = vmatprep.mubr.f32.mxu1 %v1105_v0 }
  0xfa   : > { %1044 = vmatmul.mubr.msk.f32.gmra.mxu1 %vm718_vm4, %v691_v11 }
  0xfb   : > { %807 = vmatprep.mubr.f32.mxu1 %v1105_v0 }
  0xfe   : > { %1045 = vmatmul.mubr.msk.f32.gmra.mxu1 %vm718_vm4, %v692_v12 }
  0xff   : > { %813 = vmatprep.mubr.f32.mxu1 %v1105_v0  ;;  %v706_v0 = vpop.permute.xlu0 %705 }
 0x102   : > { %1046 = vmatmul.mubr.msk.f32.gmra.mxu1 %vm718_vm4, %v693_v13 }
 0x103   : > { %v833_v43 = vpop.permute.xlu0 %832 }
 0x1b6   : > { %v797_v14 = vpop.f32.mrf.mxu1 }
 0x1b7   : > { %v798_v35 = vadd.f32 %v797_v14, %v701_v30 }
 0x1b8   : > { %v799_v15 = vpop.f32.mrf.mxu1 }
 0x1b9   : > { %v800_v33 = vadd.f32 %v799_v15, %v701_v30  ;;  %v820_v40 = vmax.f32 %v798_v35, 0.0 }
 0x1ba   : > { %v803_v16 = vpop.f32.mrf.mxu1 }
 0x1bb   : > { %v804_v31 = vadd.f32 %v803_v16, %v706_v0  ;;  %v821_v39 = vmax.f32 %v800_v33, 0.0 }
 0x1bc   : > { %v805_v17 = vpop.f32.mrf.mxu1 }
 0x1bd   : > { %v806_v28 = vadd.f32 %v805_v17, %v706_v0  ;;  %v822_v38 = vmax.f32 %v804_v31, 0.0 }
 0x1be   : > { %v809_v18 = vpop.f32.mrf.mxu1 }
 0x1bf   : > { %v810_v27 = vadd.f32 %v809_v18, %v711_v21  ;;  %v823_v37 = vmax.f32 %v806_v28, 0.0 }
 0x1c0   : > { %v811_v20 = vpop.f32.mrf.mxu1 }
 0x1c1   : > { %v812_v25 = vadd.f32 %v811_v20, %v711_v21  ;;  %v824_v36 = vmax.f32 %v810_v27, 0.0 }
 0x1c2   : > { %v815_v22 = vpop.f32.mrf.mxu1 }
 0x1c3   : > { %v816_v23 = vadd.f32 %v815_v22, %v716_v19  ;;  %v825_v34 = vmax.f32 %v812_v25, 0.0 }
 0x1c4   : > { %v817_v24 = vpop.f32.mrf.mxu1 }
 0x1c5   : > { %v818_v26 = vadd.f32 %v817_v24, %v716_v19  ;;  %v826_v32 = vmax.f32 %v816_v23, 0.0 }
 0x1c7   : > { %v827_v29 = vmax.f32 %v818_v26, 0.0 }
 0x1c9   : > { %862 = vmatprep.subr.mxu0 %v827_v29 }
 0x1ca   : > { %863 = vmatpush1.msra.mxu0 %v826_v32 }
 0x1cb   : > { %864 = vmatprep.subr.mxu0 %v825_v34 }
 0x1cc   : > { %865 = vmatpush1.msra.mxu0 %v824_v36 }
 0x1cd   : > { %866 = vmatprep.subr.mxu0 %v823_v37 }
 0x1ce   : > { %867 = vmatpush1.msra.mxu0 %v822_v38 }
 0x1cf   : > { %868 = vmatprep.subr.mxu0 %v821_v39 }
 0x1d0   : > { %869 = vmatpush1.msra.mxu0 %v820_v40 }
 0x1d1   : > { %1047 = vmatmul.mubr.msk.f32.vlgmr.msra.gmra.mxu0 %vm718_vm4, %v828_v41 }
 0x291   : > { %v904_v42 = vpop.f32.mrf.mxu0 }
 0x292   : > { %v905_v45 = vadd.f32 %v904_v42, %v833_v43 }
 0x293   : > { %v906_v44 = vpop.f32.mrf.mxu0 }
 0x294   : > { %v907_v46 = vadd.f32 %v906_v44, %v833_v43 }
 0x296   : > { %v911_v47 = vcombine.low %v905_v45, %v907_v46 }
 0x298   : > { %913 = vst [vmem:[%s406_s17] sm:$0x77] %v911_v47 }
 0x299 PF: > { %s19_s11 = sadd.s32 1, %s1103_s11   ;;  %s1300_s30 = smov %s1099_s10 }
 0x29a   : > { %p16_p5 = scmp.ge.s32.totalorder %s19_s11, 4   ;;  %s1301_s10 = smov %s1303_s12 }
 0x29c   :  { %18 = sbr.rel (!%p16_p5) target bundleno = 2 (0x2), region = 89 }

</bundles_post_ra>
